<compile_context>
chip_gen: v7x
topology: tpu7x:2x2x1
jax: 0.10.0
libtpu: 0.0.40
codegen_flags: <defaults>
</compile_context>

<pallas_src>
import jax
import jax.numpy as jnp
from jax.experimental import pallas as pl
from jax.experimental.pallas import tpu as pltpu

_LANE = 128   # TPU lane width
_HID = 128    # padded hidden width (128 -> 64 -> 32 all padded to 128 lanes)


# ----------------------------------------------------------------------------
# Fused kernel
# ----------------------------------------------------------------------------
def _fused_kernel(f_ref, mask_ref,
                  w1p, b1p, w2p, b2p, w3p, b3p, w4p, b4p,    # policy head
                  w1v, b1v, w2v, b2v, w3v, b3v, w4v, b4v,    # value head
                  out_ref):
    f3 = f_ref[...].astype(jnp.float32)                 # (TB, N, F)
    tb, n, fdim = f3.shape

    def dense(x, w_ref, b_ref, relu):
        # x: (M, in) ; w: (in, out) ; b: (1, out) -> (M, out), f32 accumulate
        y = jnp.dot(x.astype(w_ref.dtype), w_ref[...],
                    preferred_element_type=jnp.float32) + b_ref[...]
        return jnp.maximum(y, 0.0) if relu else y

    # -------- policy head: one 2-D matmul chain over all TB*N node rows ----
    x2 = f3.reshape(tb * n, fdim)                        # merge leading dims
    h = dense(x2, w1p, b1p, True)
    h = dense(h, w2p, b2p, True)
    h = dense(h, w3p, b3p, True)
    a = dense(h, w4p, b4p, False)                        # (TB*N, W); lane p*N+m = logit p
    # Fold torch's per-chunk transpose+flatten: lane c is valid only for the
    # row whose node index equals c % N -> mask-select and sum over nodes.
    a3 = a.reshape(tb, n, a.shape[-1])                   # (TB, N, W)
    pol = jnp.sum(a3 * mask_ref[...], axis=1)            # (TB, W)

    # -------- value head: node-sum from the SAME VMEM feature tile ---------
    xs = jnp.sum(f3, axis=1)                             # (TB, F)
    h = dense(xs, w1v, b1v, True)
    h = dense(h, w2v, b2v, True)
    h = dense(h, w3v, b3v, True)
    val = dense(h, w4v, b4v, False)                      # (TB, W); value at lanes [P*N, P*N+V)

    out_ref[...] = (pol + val).astype(out_ref.dtype)     # single lane-dense store


# ----------------------------------------------------------------------------
# Parameter init (torch.nn.Linear-style uniform init)
# ----------------------------------------------------------------------------
def _init_linear(key, fan_in, fan_out):
    kw, kb = jax.random.split(key)
    bound = 1.0 / jnp.sqrt(jnp.float32(fan_in))
    w = jax.random.uniform(kw, (fan_in, fan_out), jnp.float32, -bound, bound)
    b = jax.random.uniform(kb, (1, fan_out), jnp.float32, -bound, bound)
    return w, b


def init_custom_network_params(key, feature_dim, last_layer_dim_pi=2, last_layer_dim_vf=1):
    dims_pi = [feature_dim, 128, 64, 32, last_layer_dim_pi]
    dims_vf = [feature_dim, 128, 64, 32, last_layer_dim_vf]
    keys = jax.random.split(key, 8)
    policy, value = [], []
    for i in range(4):
        w, b = _init_linear(keys[i], dims_pi[i], dims_pi[i + 1])
        policy += [w, b]
    for i in range(4):
        w, b = _init_linear(keys[4 + i], dims_vf[i], dims_vf[i + 1])
        value += [w, b]
    return tuple(policy), tuple(value)


# ----------------------------------------------------------------------------
# Wrapper helpers
# ----------------------------------------------------------------------------
def _round_up(x, m):
    return (x + m - 1) // m * m


def _pick_tile_b(batch, node, target_rows=4096):
    """Largest batch tile that (a) divides batch, (b) is == batch or a
    multiple of 8 (sublane-aligned output rows), (c) keeps ~<= target_rows
    node-rows per grid step (comfortable under 32 MiB scoped VMEM on
    v5e/v6e/v7x), and (d) if possible leaves >= 2 grid steps so the
    "parallel" batch axis can use both TensorCores on v7x."""
    divs = [d for d in range(1, batch + 1)
            if batch % d == 0 and (d == batch or d % 8 == 0)]
    fitting = [d for d in divs if d * node <= target_rows]
    multi = [d for d in fitting if batch // d >= 2]
    if multi:
        return max(multi)
    if fitting:
        return max(fitting)
    return min(divs)


def _make_mask(node, P, W):
    """(node, W) mask: lane c keeps the value from node-row c % node,
    only for the real policy lanes c < P*node."""
    col = jnp.arange(W, dtype=jnp.int32)[None, :]
    row = jnp.arange(node, dtype=jnp.int32)[:, None]
    return ((col < P * node) & (col % node == row)).astype(jnp.float32)


def _prep_params(policy_params, value_params, node, P, V, W, use_bf16):
    """Pad hidden layers to 128 lanes and fold the output permutation / value
    packing into the last-layer weights.  All pads are exact zeros."""
    wdt = jnp.bfloat16 if use_bf16 else jnp.float32
    w1p, b1p, w2p, b2p, w3p, b3p, w4p, b4p = policy_params
    w1v, b1v, w2v, b2v, w3v, b3v, w4v, b4v = value_params

    def hidden(w2, b2, w3, b3):
        w2_ = jnp.pad(w2, ((0, 0), (0, _HID - w2.shape[1])))                       # (128,128)
        b2_ = jnp.pad(b2, ((0, 0), (0, _HID - b2.shape[1])))
        w3_ = jnp.pad(w3, ((0, _HID - w3.shape[0]), (0, _HID - w3.shape[1])))      # (128,128)
        b3_ = jnp.pad(b3, ((0, 0), (0, _HID - b3.shape[1])))
        return w2_, b2_, w3_, b3_

    w2p_, b2p_, w3p_, b3p_ = hidden(w2p, b2p, w3p, b3p)
    w2v_, b2v_, w3v_, b3v_ = hidden(w2v, b2v, w3v, b3v)

    # Policy last layer: repeating each output column `node` times makes lane
    # p*node+m carry logit p; the in-kernel mask then keeps only m == node-row.
    w4p_ = jnp.pad(jnp.repeat(w4p, node, axis=1),
                   ((0, _HID - w4p.shape[0]), (0, W - P * node)))                  # (128, W)
    b4p_ = jnp.pad(jnp.repeat(b4p, node, axis=1), ((0, 0), (0, W - P * node)))

    # Value last layer: place the V outputs at lanes [P*node, P*node+V).
    w4v_ = jnp.pad(w4v, ((0, _HID - w4v.shape[0]), (P * node, W - P * node - V)))  # (128, W)
    b4v_ = jnp.pad(b4v, ((0, 0), (P * node, W - P * node - V)))

    pol = (w1p.astype(wdt), b1p, w2p_.astype(wdt), b2p_,
           w3p_.astype(wdt), b3p_, w4p_.astype(wdt), b4p_)
    val = (w1v.astype(wdt), b1v, w2v_.astype(wdt), b2v_,
           w3v_.astype(wdt), b3v_, w4v_.astype(wdt), b4v_)
    return pol + val


# ----------------------------------------------------------------------------
# Forward
# ----------------------------------------------------------------------------
def custom_network_forward(features, policy_params, value_params,
                           last_layer_dim_pi=2, last_layer_dim_vf=1,
                           use_bf16=False, target_rows=4096):
    """features: (B, N, F) f32 -> (action_reshaped (B, P*N), value (B, V))."""
    B, N, F = features.shape
    P, V = last_layer_dim_pi, last_layer_dim_vf
    W = max(_LANE, _round_up(P * N + V, _LANE))   # merged lane-dense output width

    params = _prep_params(policy_params, value_params, N, P, V, W, use_bf16)
    mask = _make_mask(N, P, W)

    tile_b = _pick_tile_b(B, N, target_rows)
    grid = (B // tile_b,)

    feat_spec = pl.BlockSpec((tile_b, N, F), lambda i: (i, 0, 0))
    mask_spec = pl.BlockSpec(mask.shape, lambda i: (0, 0))
    param_specs = [pl.BlockSpec(p.shape, lambda i: (0, 0)) for p in params]
    out_spec = pl.BlockSpec((tile_b, W), lambda i: (i, 0))

    mlp_flops = 2 * (F * _HID + _HID * _HID + _HID * _HID + _HID * W)
    param_bytes = sum(int(p.size) * p.dtype.itemsize for p in params)
    cost = pl.CostEstimate(
        flops=(B * N + B) * mlp_flops,
        transcendentals=0,
        bytes_accessed=(int(features.size) * features.dtype.itemsize
                        + B * W * 4 + param_bytes + int(mask.size) * 4),
    )

    out = pl.pallas_call(
        _fused_kernel,
        grid=grid,
        in_specs=[feat_spec, mask_spec] + param_specs,
        out_specs=out_spec,
        out_shape=jax.ShapeDtypeStruct((B, W), jnp.float32),
        compiler_params=pltpu.CompilerParams(
            dimension_semantics=("parallel",),           # shard batch grid across TCs
            vmem_limit_bytes=32 * 1024 * 1024),
        cost_estimate=cost,
    )(features, mask, *params)

    # torch: vstack([chunk.T.flatten() for chunk in action.split(N)]) -> lanes [0, P*N)
    action_reshaped = out[:, :P * N]
    value = out[:, P * N:P * N + V]
    return action_reshaped, value


# ----------------------------------------------------------------------------
# Pure-JAX reference
# ----------------------------------------------------------------------------
def _mlp4(x, w1, b1, w2, b2, w3, b3, w4, b4):
    h = jnp.maximum(jnp.dot(x, w1) + b1, 0.0)
    h = jnp.maximum(jnp.dot(h, w2) + b2, 0.0)
    h = jnp.maximum(jnp.dot(h, w3) + b3, 0.0)
    return jnp.dot(h, w4) + b4


def _reference_forward(features, policy_params, value_params, last_layer_dim_pi=2):
    B, N, F = features.shape
    a = _mlp4(features.reshape(B * N, F), *policy_params)
    a = a.reshape(B, N, last_layer_dim_pi).transpose(0, 2, 1).reshape(B, -1)
    v = _mlp4(features.sum(axis=1), *value_params)
    return a, v


if __name__ == "__main__":
    key = jax.random.PRNGKey(0)
    k_feat, k_params = jax.random.split(key)

    batch = 2
    node_size = 8
    feature_dim = 16
    last_layer_dim_pi = 2
    last_layer_dim_vf = 1

    features = jax.random.normal(k_feat, (batch, node_size, feature_dim), jnp.float32)
    policy_params, value_params = init_custom_network_params(
        k_params, feature_dim, last_layer_dim_pi, last_layer_dim_vf)

    action_reshaped, value = custom_network_forward(
        features, policy_params, value_params,
        last_layer_dim_pi, last_layer_dim_vf, use_bf16=False)
    jax.block_until_ready(action_reshaped)
    jax.block_until_ready(value)

    ref_action, ref_value = _reference_forward(
        features, policy_params, value_params, last_layer_dim_pi)
    assert action_reshaped.shape == (batch, last_layer_dim_pi * node_size)
    assert value.shape == (batch, last_layer_dim_vf)
    assert jnp.allclose(action_reshaped, ref_action, atol=1e-5, rtol=1e-5)
    assert jnp.allclose(value, ref_value, atol=1e-5, rtol=1e-5)

    print("KERNEL_OK")
</pallas_src>

<mosaic_0001>
module attributes {stable_mosaic.version = 11 : i64} {
  func.func @_fused_kernel(%arg0: i32, %arg1: memref<2x8x16xf32, #tpu.memory_space<vmem>>, %arg2: memref<8x128xf32, #tpu.memory_space<vmem>>, %arg3: memref<16x128xf32, #tpu.memory_space<vmem>>, %arg4: memref<1x128xf32, #tpu.memory_space<vmem>>, %arg5: memref<128x128xf32, #tpu.memory_space<vmem>>, %arg6: memref<1x128xf32, #tpu.memory_space<vmem>>, %arg7: memref<128x128xf32, #tpu.memory_space<vmem>>, %arg8: memref<1x128xf32, #tpu.memory_space<vmem>>, %arg9: memref<128x128xf32, #tpu.memory_space<vmem>>, %arg10: memref<1x128xf32, #tpu.memory_space<vmem>>, %arg11: memref<16x128xf32, #tpu.memory_space<vmem>>, %arg12: memref<1x128xf32, #tpu.memory_space<vmem>>, %arg13: memref<128x128xf32, #tpu.memory_space<vmem>>, %arg14: memref<1x128xf32, #tpu.memory_space<vmem>>, %arg15: memref<128x128xf32, #tpu.memory_space<vmem>>, %arg16: memref<1x128xf32, #tpu.memory_space<vmem>>, %arg17: memref<128x128xf32, #tpu.memory_space<vmem>>, %arg18: memref<1x128xf32, #tpu.memory_space<vmem>>, %arg19: memref<2x128xf32, #tpu.memory_space<vmem>>) attributes {dimension_semantics = [#tpu.dimension_semantics<parallel>], iteration_bounds = array<i64: 1>, scalar_prefetch = 0 : i64, scratch_operands = 0 : i64, tpu.core_type = #tpu.core_type<tc>, window_params = [{transform_indices = @transform_0, window_bounds = array<i64: 2, 8, 16>}, {pipeline_mode = #tpu.pipeline_mode<synchronous>, transform_indices = @transform_1, window_bounds = array<i64: 8, 128>}, {pipeline_mode = #tpu.pipeline_mode<synchronous>, transform_indices = @transform_2, window_bounds = array<i64: 16, 128>}, {pipeline_mode = #tpu.pipeline_mode<synchronous>, transform_indices = @transform_3, window_bounds = array<i64: 1, 128>}, {pipeline_mode = #tpu.pipeline_mode<synchronous>, transform_indices = @transform_4, window_bounds = array<i64: 128, 128>}, {pipeline_mode = #tpu.pipeline_mode<synchronous>, transform_indices = @transform_5, window_bounds = array<i64: 1, 128>}, {pipeline_mode = #tpu.pipeline_mode<synchronous>, transform_indices = @transform_6, window_bounds = array<i64: 128, 128>}, {pipeline_mode = #tpu.pipeline_mode<synchronous>, transform_indices = @transform_7, window_bounds = array<i64: 1, 128>}, {pipeline_mode = #tpu.pipeline_mode<synchronous>, transform_indices = @transform_8, window_bounds = array<i64: 128, 128>}, {pipeline_mode = #tpu.pipeline_mode<synchronous>, transform_indices = @transform_9, window_bounds = array<i64: 1, 128>}, {pipeline_mode = #tpu.pipeline_mode<synchronous>, transform_indices = @transform_10, window_bounds = array<i64: 16, 128>}, {pipeline_mode = #tpu.pipeline_mode<synchronous>, transform_indices = @transform_11, window_bounds = array<i64: 1, 128>}, {pipeline_mode = #tpu.pipeline_mode<synchronous>, transform_indices = @transform_12, window_bounds = array<i64: 128, 128>}, {pipeline_mode = #tpu.pipeline_mode<synchronous>, transform_indices = @transform_13, window_bounds = array<i64: 1, 128>}, {pipeline_mode = #tpu.pipeline_mode<synchronous>, transform_indices = @transform_14, window_bounds = array<i64: 128, 128>}, {pipeline_mode = #tpu.pipeline_mode<synchronous>, transform_indices = @transform_15, window_bounds = array<i64: 1, 128>}, {pipeline_mode = #tpu.pipeline_mode<synchronous>, transform_indices = @transform_16, window_bounds = array<i64: 128, 128>}, {pipeline_mode = #tpu.pipeline_mode<synchronous>, transform_indices = @transform_17, window_bounds = array<i64: 1, 128>}, {transform_indices = @transform_18, window_bounds = array<i64: 2, 128>}]} {
    %c0 = arith.constant 0 : index
    %c0_0 = arith.constant 0 : index
    %c0_1 = arith.constant 0 : index
    %0 = vector.load %arg1[%c0, %c0_0, %c0_1] : memref<2x8x16xf32, #tpu.memory_space<vmem>>, vector<2x8x16xf32>
    %1 = vector.shape_cast %0 : vector<2x8x16xf32> to vector<16x16xf32>
    %c0_2 = arith.constant 0 : index
    %c0_3 = arith.constant 0 : index
    %2 = vector.load %arg3[%c0_2, %c0_3] : memref<16x128xf32, #tpu.memory_space<vmem>>, vector<16x128xf32>
    %cst = arith.constant dense<0.000000e+00> : vector<16x128xf32>
    %3 = tpu.matmul %1, %2, %cst {dimension_numbers = #tpu.dot_dimension_numbers<[1], [0], [0], [1], [0, 0, 1, 1], [], []>} : vector<16x16xf32>, vector<16x128xf32>, vector<16x128xf32> -> vector<16x128xf32>
    %c0_4 = arith.constant 0 : index
    %c0_5 = arith.constant 0 : index
    %4 = vector.load %arg4[%c0_4, %c0_5] : memref<1x128xf32, #tpu.memory_space<vmem>>, vector<1x128xf32>
    %5 = vector.broadcast %4 : vector<1x128xf32> to vector<16x128xf32>
    %6 = arith.addf %3, %5 : vector<16x128xf32>
    %cst_6 = arith.constant 0.000000e+00 : f32
    %7 = vector.broadcast %cst_6 : f32 to vector<16x128xf32>
    %8 = arith.maximumf %6, %7 : vector<16x128xf32>
    %c0_7 = arith.constant 0 : index
    %c0_8 = arith.constant 0 : index
    %9 = vector.load %arg5[%c0_7, %c0_8] : memref<128x128xf32, #tpu.memory_space<vmem>>, vector<128x128xf32>
    %cst_9 = arith.constant dense<0.000000e+00> : vector<16x128xf32>
    %10 = tpu.matmul %8, %9, %cst_9 {dimension_numbers = #tpu.dot_dimension_numbers<[1], [0], [0], [1], [0, 0, 1, 1], [], []>} : vector<16x128xf32>, vector<128x128xf32>, vector<16x128xf32> -> vector<16x128xf32>
    %c0_10 = arith.constant 0 : index
    %c0_11 = arith.constant 0 : index
    %11 = vector.load %arg6[%c0_10, %c0_11] : memref<1x128xf32, #tpu.memory_space<vmem>>, vector<1x128xf32>
    %12 = vector.broadcast %11 : vector<1x128xf32> to vector<16x128xf32>
    %13 = arith.addf %10, %12 : vector<16x128xf32>
    %cst_12 = arith.constant 0.000000e+00 : f32
    %14 = vector.broadcast %cst_12 : f32 to vector<16x128xf32>
    %15 = arith.maximumf %13, %14 : vector<16x128xf32>
    %c0_13 = arith.constant 0 : index
    %c0_14 = arith.constant 0 : index
    %16 = vector.load %arg7[%c0_13, %c0_14] : memref<128x128xf32, #tpu.memory_space<vmem>>, vector<128x128xf32>
    %cst_15 = arith.constant dense<0.000000e+00> : vector<16x128xf32>
    %17 = tpu.matmul %15, %16, %cst_15 {dimension_numbers = #tpu.dot_dimension_numbers<[1], [0], [0], [1], [0, 0, 1, 1], [], []>} : vector<16x128xf32>, vector<128x128xf32>, vector<16x128xf32> -> vector<16x128xf32>
    %c0_16 = arith.constant 0 : index
    %c0_17 = arith.constant 0 : index
    %18 = vector.load %arg8[%c0_16, %c0_17] : memref<1x128xf32, #tpu.memory_space<vmem>>, vector<1x128xf32>
    %19 = vector.broadcast %18 : vector<1x128xf32> to vector<16x128xf32>
    %20 = arith.addf %17, %19 : vector<16x128xf32>
    %cst_18 = arith.constant 0.000000e+00 : f32
    %21 = vector.broadcast %cst_18 : f32 to vector<16x128xf32>
    %22 = arith.maximumf %20, %21 : vector<16x128xf32>
    %c0_19 = arith.constant 0 : index
    %c0_20 = arith.constant 0 : index
    %23 = vector.load %arg9[%c0_19, %c0_20] : memref<128x128xf32, #tpu.memory_space<vmem>>, vector<128x128xf32>
    %cst_21 = arith.constant dense<0.000000e+00> : vector<16x128xf32>
    %24 = tpu.matmul %22, %23, %cst_21 {dimension_numbers = #tpu.dot_dimension_numbers<[1], [0], [0], [1], [0, 0, 1, 1], [], []>} : vector<16x128xf32>, vector<128x128xf32>, vector<16x128xf32> -> vector<16x128xf32>
    %c0_22 = arith.constant 0 : index
    %c0_23 = arith.constant 0 : index
    %25 = vector.load %arg10[%c0_22, %c0_23] : memref<1x128xf32, #tpu.memory_space<vmem>>, vector<1x128xf32>
    %26 = vector.broadcast %25 : vector<1x128xf32> to vector<16x128xf32>
    %27 = arith.addf %24, %26 : vector<16x128xf32>
    %28 = vector.shape_cast %27 : vector<16x128xf32> to vector<2x8x128xf32>
    %c0_24 = arith.constant 0 : index
    %c0_25 = arith.constant 0 : index
    %29 = vector.load %arg2[%c0_24, %c0_25] : memref<8x128xf32, #tpu.memory_space<vmem>>, vector<8x128xf32>
    %30 = vector.shape_cast %29 : vector<8x128xf32> to vector<1x8x128xf32>
    %31 = vector.broadcast %30 : vector<1x8x128xf32> to vector<2x8x128xf32>
    %32 = arith.mulf %28, %31 : vector<2x8x128xf32>
    %cst_26 = arith.constant dense<0.000000e+00> : vector<2x128xf32>
    %33 = vector.multi_reduction <add>, %32, %cst_26 [1] : vector<2x8x128xf32> to vector<2x128xf32>
    %cst_27 = arith.constant dense<0.000000e+00> : vector<2x16xf32>
    %34 = vector.multi_reduction <add>, %0, %cst_27 [1] : vector<2x8x16xf32> to vector<2x16xf32>
    %c0_28 = arith.constant 0 : index
    %c0_29 = arith.constant 0 : index
    %35 = vector.load %arg11[%c0_28, %c0_29] : memref<16x128xf32, #tpu.memory_space<vmem>>, vector<16x128xf32>
    %cst_30 = arith.constant dense<0.000000e+00> : vector<2x128xf32>
    %36 = tpu.matmul %34, %35, %cst_30 {dimension_numbers = #tpu.dot_dimension_numbers<[1], [0], [0], [1], [0, 0, 1, 1], [], []>} : vector<2x16xf32>, vector<16x128xf32>, vector<2x128xf32> -> vector<2x128xf32>
    %c0_31 = arith.constant 0 : index
    %c0_32 = arith.constant 0 : index
    %37 = vector.load %arg12[%c0_31, %c0_32] : memref<1x128xf32, #tpu.memory_space<vmem>>, vector<1x128xf32>
    %38 = vector.broadcast %37 : vector<1x128xf32> to vector<2x128xf32>
    %39 = arith.addf %36, %38 : vector<2x128xf32>
    %cst_33 = arith.constant 0.000000e+00 : f32
    %40 = vector.broadcast %cst_33 : f32 to vector<2x128xf32>
    %41 = arith.maximumf %39, %40 : vector<2x128xf32>
    %c0_34 = arith.constant 0 : index
    %c0_35 = arith.constant 0 : index
    %42 = vector.load %arg13[%c0_34, %c0_35] : memref<128x128xf32, #tpu.memory_space<vmem>>, vector<128x128xf32>
    %cst_36 = arith.constant dense<0.000000e+00> : vector<2x128xf32>
    %43 = tpu.matmul %41, %42, %cst_36 {dimension_numbers = #tpu.dot_dimension_numbers<[1], [0], [0], [1], [0, 0, 1, 1], [], []>} : vector<2x128xf32>, vector<128x128xf32>, vector<2x128xf32> -> vector<2x128xf32>
    %c0_37 = arith.constant 0 : index
    %c0_38 = arith.constant 0 : index
    %44 = vector.load %arg14[%c0_37, %c0_38] : memref<1x128xf32, #tpu.memory_space<vmem>>, vector<1x128xf32>
    %45 = vector.broadcast %44 : vector<1x128xf32> to vector<2x128xf32>
    %46 = arith.addf %43, %45 : vector<2x128xf32>
    %cst_39 = arith.constant 0.000000e+00 : f32
    %47 = vector.broadcast %cst_39 : f32 to vector<2x128xf32>
    %48 = arith.maximumf %46, %47 : vector<2x128xf32>
    %c0_40 = arith.constant 0 : index
    %c0_41 = arith.constant 0 : index
    %49 = vector.load %arg15[%c0_40, %c0_41] : memref<128x128xf32, #tpu.memory_space<vmem>>, vector<128x128xf32>
    %cst_42 = arith.constant dense<0.000000e+00> : vector<2x128xf32>
    %50 = tpu.matmul %48, %49, %cst_42 {dimension_numbers = #tpu.dot_dimension_numbers<[1], [0], [0], [1], [0, 0, 1, 1], [], []>} : vector<2x128xf32>, vector<128x128xf32>, vector<2x128xf32> -> vector<2x128xf32>
    %c0_43 = arith.constant 0 : index
    %c0_44 = arith.constant 0 : index
    %51 = vector.load %arg16[%c0_43, %c0_44] : memref<1x128xf32, #tpu.memory_space<vmem>>, vector<1x128xf32>
    %52 = vector.broadcast %51 : vector<1x128xf32> to vector<2x128xf32>
    %53 = arith.addf %50, %52 : vector<2x128xf32>
    %cst_45 = arith.constant 0.000000e+00 : f32
    %54 = vector.broadcast %cst_45 : f32 to vector<2x128xf32>
    %55 = arith.maximumf %53, %54 : vector<2x128xf32>
    %c0_46 = arith.constant 0 : index
    %c0_47 = arith.constant 0 : index
    %56 = vector.load %arg17[%c0_46, %c0_47] : memref<128x128xf32, #tpu.memory_space<vmem>>, vector<128x128xf32>
    %cst_48 = arith.constant dense<0.000000e+00> : vector<2x128xf32>
    %57 = tpu.matmul %55, %56, %cst_48 {dimension_numbers = #tpu.dot_dimension_numbers<[1], [0], [0], [1], [0, 0, 1, 1], [], []>} : vector<2x128xf32>, vector<128x128xf32>, vector<2x128xf32> -> vector<2x128xf32>
    %c0_49 = arith.constant 0 : index
    %c0_50 = arith.constant 0 : index
    %58 = vector.load %arg18[%c0_49, %c0_50] : memref<1x128xf32, #tpu.memory_space<vmem>>, vector<1x128xf32>
    %59 = vector.broadcast %58 : vector<1x128xf32> to vector<2x128xf32>
    %60 = arith.addf %57, %59 : vector<2x128xf32>
    %61 = arith.addf %33, %60 : vector<2x128xf32>
    %c0_51 = arith.constant 0 : index
    %c0_52 = arith.constant 0 : index
    %62 = vector.load %arg19[%c0_51, %c0_52] : memref<2x128xf32, #tpu.memory_space<vmem>>, vector<2x128xf32>
    tpu.vector_store %arg19[%c0_51, %c0_52], %61 {strides = array<i32>} : memref<2x128xf32, #tpu.memory_space<vmem>>, vector<2x128xf32>,
    return
  }
  func.func @transform_0(%arg0: i32) -> (i32, i32, i32) {
    %c0_i32 = arith.constant 0 : i32
    %c0_i32_0 = arith.constant 0 : i32
    %c0_i32_1 = arith.constant 0 : i32
    return %arg0, %c0_i32, %c0_i32_0 : i32, i32, i32
  }
  func.func @transform_1(%arg0: i32) -> (i32, i32) {
    %c0_i32 = arith.constant 0 : i32
    %c0_i32_0 = arith.constant 0 : i32
    %c0_i32_1 = arith.constant 0 : i32
    return %c0_i32, %c0_i32_0 : i32, i32
  }
  func.func @transform_2(%arg0: i32) -> (i32, i32) {
    %c0_i32 = arith.constant 0 : i32
    %c0_i32_0 = arith.constant 0 : i32
    %c0_i32_1 = arith.constant 0 : i32
    return %c0_i32, %c0_i32_0 : i32, i32
  }
  func.func @transform_3(%arg0: i32) -> (i32, i32) {
    %c0_i32 = arith.constant 0 : i32
    %c0_i32_0 = arith.constant 0 : i32
    %c0_i32_1 = arith.constant 0 : i32
    return %c0_i32, %c0_i32_0 : i32, i32
  }
  func.func @transform_4(%arg0: i32) -> (i32, i32) {
    %c0_i32 = arith.constant 0 : i32
    %c0_i32_0 = arith.constant 0 : i32
    %c0_i32_1 = arith.constant 0 : i32
    return %c0_i32, %c0_i32_0 : i32, i32
  }
  func.func @transform_5(%arg0: i32) -> (i32, i32) {
    %c0_i32 = arith.constant 0 : i32
    %c0_i32_0 = arith.constant 0 : i32
    %c0_i32_1 = arith.constant 0 : i32
    return %c0_i32, %c0_i32_0 : i32, i32
  }
  func.func @transform_6(%arg0: i32) -> (i32, i32) {
    %c0_i32 = arith.constant 0 : i32
    %c0_i32_0 = arith.constant 0 : i32
    %c0_i32_1 = arith.constant 0 : i32
    return %c0_i32, %c0_i32_0 : i32, i32
  }
  func.func @transform_7(%arg0: i32) -> (i32, i32) {
    %c0_i32 = arith.constant 0 : i32
    %c0_i32_0 = arith.constant 0 : i32
    %c0_i32_1 = arith.constant 0 : i32
    return %c0_i32, %c0_i32_0 : i32, i32
  }
  func.func @transform_8(%arg0: i32) -> (i32, i32) {
    %c0_i32 = arith.constant 0 : i32
    %c0_i32_0 = arith.constant 0 : i32
    %c0_i32_1 = arith.constant 0 : i32
    return %c0_i32, %c0_i32_0 : i32, i32
  }
  func.func @transform_9(%arg0: i32) -> (i32, i32) {
    %c0_i32 = arith.constant 0 : i32
    %c0_i32_0 = arith.constant 0 : i32
    %c0_i32_1 = arith.constant 0 : i32
    return %c0_i32, %c0_i32_0 : i32, i32
  }
  func.func @transform_10(%arg0: i32) -> (i32, i32) {
    %c0_i32 = arith.constant 0 : i32
    %c0_i32_0 = arith.constant 0 : i32
    %c0_i32_1 = arith.constant 0 : i32
    return %c0_i32, %c0_i32_0 : i32, i32
  }
  func.func @transform_11(%arg0: i32) -> (i32, i32) {
    %c0_i32 = arith.constant 0 : i32
    %c0_i32_0 = arith.constant 0 : i32
    %c0_i32_1 = arith.constant 0 : i32
    return %c0_i32, %c0_i32_0 : i32, i32
  }
  func.func @transform_12(%arg0: i32) -> (i32, i32) {
    %c0_i32 = arith.constant 0 : i32
    %c0_i32_0 = arith.constant 0 : i32
    %c0_i32_1 = arith.constant 0 : i32
    return %c0_i32, %c0_i32_0 : i32, i32
  }
  func.func @transform_13(%arg0: i32) -> (i32, i32) {
    %c0_i32 = arith.constant 0 : i32
    %c0_i32_0 = arith.constant 0 : i32
    %c0_i32_1 = arith.constant 0 : i32
    return %c0_i32, %c0_i32_0 : i32, i32
  }
  func.func @transform_14(%arg0: i32) -> (i32, i32) {
    %c0_i32 = arith.constant 0 : i32
    %c0_i32_0 = arith.constant 0 : i32
    %c0_i32_1 = arith.constant 0 : i32
    return %c0_i32, %c0_i32_0 : i32, i32
  }
  func.func @transform_15(%arg0: i32) -> (i32, i32) {
    %c0_i32 = arith.constant 0 : i32
    %c0_i32_0 = arith.constant 0 : i32
    %c0_i32_1 = arith.constant 0 : i32
    return %c0_i32, %c0_i32_0 : i32, i32
  }
  func.func @transform_16(%arg0: i32) -> (i32, i32) {
    %c0_i32 = arith.constant 0 : i32
    %c0_i32_0 = arith.constant 0 : i32
    %c0_i32_1 = arith.constant 0 : i32
    return %c0_i32, %c0_i32_0 : i32, i32
  }
  func.func @transform_17(%arg0: i32) -> (i32, i32) {
    %c0_i32 = arith.constant 0 : i32
    %c0_i32_0 = arith.constant 0 : i32
    %c0_i32_1 = arith.constant 0 : i32
    return %c0_i32, %c0_i32_0 : i32, i32
  }
  func.func @transform_18(%arg0: i32) -> (i32, i32) {
    %c0_i32 = arith.constant 0 : i32
    %c0_i32_0 = arith.constant 0 : i32
    return %arg0, %c0_i32 : i32, i32
  }
}

</mosaic_0001>

<bundles_post_ra>
// kernel: tpu_custom_call.1
= control target key start
LH: loop header
LB: loop body
LE: loop exit
PB: predicated region body
PF: predicated region fallthrough
CT: control target
= control target key end

     0   :  { %s2101_s0 = inlined_call_operand.hbm [shape: f32[2,8,16], index: 0, kind: input, shape index: {}]   ;;  %s2102_s1 = inlined_call_operand.hbm [shape: f32[8,128], index: 1, kind: input, shape index: {}]   ;;  %s2103_s2 = inlined_call_operand.hbm [shape: f32[16,128], index: 2, kind: input, shape index: {}]   ;;  %s2104_s3 = inlined_call_operand.vmem [shape: f32[1,128], index: 3, kind: input, shape index: {}]   ;;  %s2105_s4 = inlined_call_operand.hbm [shape: f32[128,128], index: 4, kind: input, shape index: {}]   ;;  %s2106_s5 = inlined_call_operand.vmem [shape: f32[1,128], index: 5, kind: input, shape index: {}]   ;;  %s2107_s6 = inlined_call_operand.hbm [shape: f32[128,128], index: 6, kind: input, shape index: {}]   ;;  %s2108_s7 = inlined_call_operand.vmem [shape: f32[1,128], index: 7, kind: input, shape index: {}]   ;;  %s2109_s8 = inlined_call_operand.hbm [shape: f32[128,128], index: 8, kind: input, shape index: {}]   ;;  %s2110_s9 = inlined_call_operand.vmem [shape: f32[1,128], index: 9, kind: input, shape index: {}]   ;;  %s2111_s10 = inlined_call_operand.vmem [shape: f32[16,128], index: 10, kind: input, shape index: {}]   ;;  %s2112_s11 = inlined_call_operand.vmem [shape: f32[1,128], index: 11, kind: input, shape index: {}]   ;;  %s2113_s12 = inlined_call_operand.hbm [shape: f32[128,128], index: 12, kind: input, shape index: {}]   ;;  %s2114_s13 = inlined_call_operand.vmem [shape: f32[1,128], index: 13, kind: input, shape index: {}]   ;;  %s2115_s14 = inlined_call_operand.hbm [shape: f32[128,128], index: 14, kind: input, shape index: {}]   ;;  %s2116_s15 = inlined_call_operand.vmem [shape: f32[1,128], index: 15, kind: input, shape index: {}]   ;;  %s2117_s16 = inlined_call_operand.hbm [shape: f32[128,128], index: 16, kind: input, shape index: {}]   ;;  %s2118_s17 = inlined_call_operand.vmem [shape: f32[1,128], index: 17, kind: input, shape index: {}]   ;;  %s2119_s18 = inlined_call_operand.hbm [shape: f32[2,128], index: 18, kind: output, shape index: {}]  }
   0x1   :  { %2123 = sst [smem:[#allocation24_spill]] %s2101_s0 }
   0x2   :  { %2124 = sst [smem:[#allocation25_spill]] %s2102_s1 }
   0x3   :  { %2125 = sst [smem:[#allocation26_spill]] %s2103_s2 }
   0x4   :  { %23 = vsyncpa [#allocation3], 0 }
   0x5   :  { %24 = vsyncpa [#allocation6], 0 }
   0x6   :  { %25 = vsyncpa [#allocation9], 0 }
   0x7   :  { %26 = vsyncpa [#allocation12], 0 }
   0x8   :  { %27 = vsyncpa [#allocation15], 0 }
   0x9   :  { %28 = vsyncpa [#allocation4], 0  ;;  %s1769_s27 = smov [#allocation5]   ;;  %s2126_s0 = sld [smem:[#allocation25_spill]] }
   0xa   :  { %s47_s28 = sshll.u32 %s1769_s27, 4  ;;  %s48_s28 = int_to_ptr.vmem [resolvable:$true] %s47_s28 }
   0xf   :  { %s1537_s19 = scalar_lea.hbm %s2126_s0, 128 }
  0x10   :  { %p1538_p0 = scmp.ne.s32.totalorder %s2126_s0, %s1537_s19  ;;  %p1541_p1 = scmp.lt.u32.totalorder %s1537_s19, %s2126_s0 }
  0x12   :  { %p1543_p2 = pnand %p1541_p1, %p1538_p0 }
  0x14   :  { %1546 = shalt.err (!%p1543_p2)
}
  0x15   :  { %s1547_s2 = scalar_lea.vmem %s48_s28, 128  ;;  %p1552_p4 = scmp.lt.s32.totalorder %s48_s28, %s48_s28 }
  0x16   :  { %p1548_p3 = scmp.ne.s32.totalorder %s48_s28, %s1547_s2  ;;  %p1553_p5 = scmp.lt.s32.totalorder %s1547_s2, %s1547_s2 }
  0x18   :  { %p1554_p6 = por %p1553_p5, %p1552_p4 }
  0x1a   :  { %p1555_p7 = pnand %p1554_p6, %p1548_p3 }
  0x1c   :  { %1558 = shalt.err (!%p1555_p7)
}
  0x1d   :  { %50 = dma.hbm_to_vmem [thread:$0]  %s2126_s0, 128, %s48_s28, [#allocation6]  }
  0x1e   :  { %s1770_s25 = smov [#allocation8]   ;;  %s1771_s27 = smov [#allocation11]  }
  0x1f   :  { %s70_s26 = sshll.u32 %s1770_s25, 4  ;;  %s98_s29 = sshll.u32 %s1771_s27, 4  ;;  %s71_s26 = int_to_ptr.vmem [resolvable:$true] %s70_s26  ;;  %s99_s29 = int_to_ptr.vmem [resolvable:$true] %s98_s29 }
  0x20   :  { %s1559_s1 = scalar_lea.hbm %s2105_s4, 2048 }
  0x21   :  { %p1560_p8 = scmp.ne.s32.totalorder %s2105_s4, %s1559_s1  ;;  %p1563_p9 = scmp.lt.u32.totalorder %s1559_s1, %s2105_s4 }
  0x23   :  { %p1565_p10 = pnand %p1563_p9, %p1560_p8 }
  0x25   :  { %1568 = shalt.err (!%p1565_p10)
}
  0x26   :  { %s1569_s28 = scalar_lea.vmem %s71_s26, 2048  ;;  %p1574_p12 = scmp.lt.s32.totalorder %s71_s26, %s71_s26 }
  0x27   :  { %p1570_p11 = scmp.ne.s32.totalorder %s71_s26, %s1569_s28  ;;  %p1575_p13 = scmp.lt.s32.totalorder %s1569_s28, %s1569_s28 }
  0x29   :  { %p1576_p0 = por %p1575_p13, %p1574_p12 }
  0x2b   :  { %p1577_p1 = pnand %p1576_p0, %p1570_p11 }
  0x2d   :  { %1580 = shalt.err (!%p1577_p1)
}
  0x2e   :  { %s1772_s0 = smov 128   ;;  %s1773_s23 = smov 8  }
  0x2f   :  { %76 = dma.hbm_to_vmem [thread:$0]  %s2105_s4, 2048, %s71_s26, [#allocation9], %s1772_s0, %s1772_s0, %s1773_s23  }
  0x30   :  { %s1581_s19 = scalar_lea.hbm %s2109_s8, 2048 }
  0x31   :  { %p1582_p2 = scmp.ne.s32.totalorder %s2109_s8, %s1581_s19  ;;  %p1585_p3 = scmp.lt.u32.totalorder %s1581_s19, %s2109_s8 }
  0x33   :  { %p1587_p4 = pnand %p1585_p3, %p1582_p2 }
  0x35   :  { %1590 = shalt.err (!%p1587_p4)
}
  0x36   :  { %s1591_s2 = scalar_lea.vmem %s99_s29, 2048  ;;  %p1596_p6 = scmp.lt.s32.totalorder %s99_s29, %s99_s29 }
  0x37   :  { %p1592_p5 = scmp.ne.s32.totalorder %s99_s29, %s1591_s2  ;;  %p1597_p7 = scmp.lt.s32.totalorder %s1591_s2, %s1591_s2 }
  0x39   :  { %p1598_p8 = por %p1597_p7, %p1596_p6 }
  0x3b   :  { %p1599_p9 = pnand %p1598_p8, %p1592_p5 }
  0x3d   :  { %1602 = shalt.err (!%p1599_p9)
}
  0x3e   :  { %104 = dma.hbm_to_vmem [thread:$0]  %s2109_s8, 2048, %s99_s29, [#allocation12], %s1772_s0, %s1772_s0, %s1773_s23  }
  0x3f   :  { %s1774_s28 = smov [#allocation14]   ;;  %s1775_s25 = smov [#allocation2]  }
  0x40   :  { %s130_s24 = sshll.u32 %s1774_s28, 4  ;;  %s34_s27 = sshll.u32 %s1775_s25, 4  ;;  %s131_s24 = int_to_ptr.vmem [resolvable:$true] %s130_s24  ;;  %s35_s27 = int_to_ptr.vmem [resolvable:$true] %s34_s27 }
  0x41   :  { %s1603_s1 = scalar_lea.hbm %s2115_s14, 2048 }
  0x42   :  { %p1604_p10 = scmp.ne.s32.totalorder %s2115_s14, %s1603_s1  ;;  %p1607_p11 = scmp.lt.u32.totalorder %s1603_s1, %s2115_s14 }
  0x44   :  { %p1609_p12 = pnand %p1607_p11, %p1604_p10 }
  0x46   :  { %1612 = shalt.err (!%p1609_p12)
}
  0x47   :  { %s1613_s8 = scalar_lea.vmem %s131_s24, 2048  ;;  %p1618_p0 = scmp.lt.s32.totalorder %s131_s24, %s131_s24 }
  0x48   :  { %p1614_p13 = scmp.ne.s32.totalorder %s131_s24, %s1613_s8  ;;  %p1619_p1 = scmp.lt.s32.totalorder %s1613_s8, %s1613_s8 }
  0x4a   :  { %p1620_p2 = por %p1619_p1, %p1618_p0 }
  0x4c   :  { %p1621_p3 = pnand %p1620_p2, %p1614_p13 }
  0x4e   :  { %1624 = shalt.err (!%p1621_p3)
}
  0x4f   :  { %136 = dma.hbm_to_vmem [thread:$0]  %s2115_s14, 2048, %s131_s24, [#allocation15], %s1772_s0, %s1772_s0, %s1773_s23  }
  0x50   :  { %s2127_s25 = sld [smem:[#allocation24_spill]] }
  0x56   :  { %s1625_s30 = scalar_lea.hbm %s2127_s25, 256 }
  0x57   :  { %p1626_p4 = scmp.ne.s32.totalorder %s2127_s25, %s1625_s30  ;;  %p1629_p5 = scmp.lt.u32.totalorder %s1625_s30, %s2127_s25 }
  0x59   :  { %p1631_p6 = pnand %p1629_p5, %p1626_p4 }
  0x5b   :  { %1634 = shalt.err (!%p1631_p6)
}
  0x5c   :  { %s1635_s22 = scalar_lea.vmem %s35_s27, 256  ;;  %p1640_p8 = scmp.lt.s32.totalorder %s35_s27, %s35_s27 }
  0x5d   :  { %p1636_p7 = scmp.ne.s32.totalorder %s35_s27, %s1635_s22  ;;  %p1641_p9 = scmp.lt.s32.totalorder %s1635_s22, %s1635_s22 }
  0x5f   :  { %p1642_p10 = por %p1641_p9, %p1640_p8 }
  0x61   :  { %p1643_p11 = pnand %p1642_p10, %p1636_p7 }
  0x63   :  { %1646 = shalt.err (!%p1643_p11)
}
  0x64   :  { %40 = dma.hbm_to_vmem [thread:$0]  %s2127_s25, 256, %s35_s27, [#allocation3], %s1772_s0, %s1772_s0, %s1773_s23  }
  0x65   :  { %s1776_s2 = smov [#allocation7]   ;;  %s1777_s29 = smov [#allocation10]  }
  0x66   :  { %s56_s8 = sshll.u32 %s1776_s2, 4  ;;  %s84_s4 = sshll.u32 %s1777_s29, 4  ;;  %s57_s8 = int_to_ptr.vmem [resolvable:$true] %s56_s8  ;;  %s85_s4 = int_to_ptr.vmem [resolvable:$true] %s84_s4 }
  0x67   :  { %s2128_s30 = sld [smem:[#allocation26_spill]] }
  0x6d   :  { %s1647_s19 = scalar_lea.hbm %s2128_s30, 256 }
  0x6e   :  { %p1648_p12 = scmp.ne.s32.totalorder %s2128_s30, %s1647_s19  ;;  %p1651_p13 = scmp.lt.u32.totalorder %s1647_s19, %s2128_s30 }
  0x70   :  { %p1653_p0 = pnand %p1651_p13, %p1648_p12 }
  0x72   :  { %1656 = shalt.err (!%p1653_p0)
}
  0x73   :  { %s1657_s27 = scalar_lea.vmem %s57_s8, 256  ;;  %p1662_p2 = scmp.lt.s32.totalorder %s57_s8, %s57_s8 }
  0x74   :  { %p1658_p1 = scmp.ne.s32.totalorder %s57_s8, %s1657_s27  ;;  %p1663_p3 = scmp.lt.s32.totalorder %s1657_s27, %s1657_s27 }
  0x76   :  { %p1664_p4 = por %p1663_p3, %p1662_p2 }
  0x78   :  { %p1665_p5 = pnand %p1664_p4, %p1658_p1 }
  0x7a   :  { %1668 = shalt.err (!%p1665_p5)
}
  0x7b   :  { %62 = dma.hbm_to_vmem [thread:$0]  %s2128_s30, 256, %s57_s8, [#allocation6], %s1772_s0, %s1772_s0, %s1773_s23  }
  0x7c   :  { %s1669_s29 = scalar_lea.hbm %s2107_s6, 2048 }
  0x7d   :  { %p1670_p6 = scmp.ne.s32.totalorder %s2107_s6, %s1669_s29  ;;  %p1673_p7 = scmp.lt.u32.totalorder %s1669_s29, %s2107_s6 }
  0x7f   :  { %p1675_p8 = pnand %p1673_p7, %p1670_p6 }
  0x81   :  { %1678 = shalt.err (!%p1675_p8)
}
  0x82   :  { %s1679_s20 = scalar_lea.vmem %s85_s4, 2048  ;;  %p1684_p10 = scmp.lt.s32.totalorder %s85_s4, %s85_s4 }
  0x83   :  { %p1680_p9 = scmp.ne.s32.totalorder %s85_s4, %s1679_s20  ;;  %p1685_p11 = scmp.lt.s32.totalorder %s1679_s20, %s1679_s20 }
  0x85   :  { %p1686_p12 = por %p1685_p11, %p1684_p10 }
  0x87   :  { %p1687_p13 = pnand %p1686_p12, %p1680_p9 }
  0x89   :  { %1690 = shalt.err (!%p1687_p13)
}
  0x8a   :  { %90 = dma.hbm_to_vmem [thread:$0]  %s2107_s6, 2048, %s85_s4, [#allocation9], %s1772_s0, %s1772_s0, %s1773_s23  }
  0x8b   :  { %s1778_s21 = smov [#allocation13]   ;;  %s1779_s27 = smov [#allocation16]  }
  0x8c   :  { %s116_s22 = sshll.u32 %s1778_s21, 4  ;;  %s144_s25 = sshll.u32 %s1779_s27, 4  ;;  %s117_s22 = int_to_ptr.vmem [resolvable:$true] %s116_s22  ;;  %s145_s25 = int_to_ptr.vmem [resolvable:$true] %s144_s25 }
  0x8d   :  { %s1691_s2 = scalar_lea.hbm %s2113_s12, 2048 }
  0x8e   :  { %p1692_p0 = scmp.ne.s32.totalorder %s2113_s12, %s1691_s2  ;;  %p1695_p1 = scmp.lt.u32.totalorder %s1691_s2, %s2113_s12 }
  0x90   :  { %p1697_p2 = pnand %p1695_p1, %p1692_p0 }
  0x92   :  { %1700 = shalt.err (!%p1697_p2)
}
  0x93   :  { %s1701_s6 = scalar_lea.vmem %s117_s22, 2048  ;;  %p1706_p4 = scmp.lt.s32.totalorder %s117_s22, %s117_s22 }
  0x94   :  { %p1702_p3 = scmp.ne.s32.totalorder %s117_s22, %s1701_s6  ;;  %p1707_p5 = scmp.lt.s32.totalorder %s1701_s6, %s1701_s6 }
  0x96   :  { %p1708_p6 = por %p1707_p5, %p1706_p4 }
  0x98   :  { %p1709_p7 = pnand %p1708_p6, %p1702_p3 }
  0x9a   :  { %1712 = shalt.err (!%p1709_p7)
}
  0x9b   :  { %122 = dma.hbm_to_vmem [thread:$0]  %s2113_s12, 2048, %s117_s22, [#allocation12], %s1772_s0, %s1772_s0, %s1773_s23  }
  0x9c   :  { %s1713_s30 = scalar_lea.hbm %s2117_s16, 2048 }
  0x9d   :  { %p1714_p8 = scmp.ne.s32.totalorder %s2117_s16, %s1713_s30  ;;  %p1717_p9 = scmp.lt.u32.totalorder %s1713_s30, %s2117_s16 }
  0x9f   :  { %p1719_p10 = pnand %p1717_p9, %p1714_p8 }
  0xa1   :  { %1722 = shalt.err (!%p1719_p10)
}
  0xa2   :  { %s1723_s2 = scalar_lea.vmem %s145_s25, 2048  ;;  %p1728_p12 = scmp.lt.s32.totalorder %s145_s25, %s145_s25 }
  0xa3   :  { %p1724_p11 = scmp.ne.s32.totalorder %s145_s25, %s1723_s2  ;;  %p1729_p13 = scmp.lt.s32.totalorder %s1723_s2, %s1723_s2 }
  0xa5   :  { %p1730_p0 = por %p1729_p13, %p1728_p12 }
  0xa7   :  { %p1731_p1 = pnand %p1730_p0, %p1724_p11 }
  0xa9   :  { %1734 = shalt.err (!%p1731_p1)
}
  0xaa   :  { %150 = dma.hbm_to_vmem [thread:$0]  %s2117_s16, 2048, %s145_s25, [#allocation15], %s1772_s0, %s1772_s0, %s1773_s23  }
  0xab   :  { %1757 = dma.done.wait [#allocation3], 256  }
  0xac   :  { %1758 = vsyncadd [#allocation3], 4294967040 }
  0xad   :  { %1759 = dma.done.wait [#allocation6], 384  }
  0xae   :  { %1760 = vsyncadd [#allocation6], 4294966912 }
  0xaf   :  { %1761 = dma.done.wait [#allocation9], 4096  }
  0xb0   :  { %1762 = vsyncadd [#allocation9], 4294963200 }
  0xb1   :  { %1763 = dma.done.wait [#allocation12], 4096  }
  0xb2   :  { %1764 = vsyncadd [#allocation12], 4294963200 }
  0xb3   :  { %1765 = dma.done.wait [#allocation15], 4096  }
  0xb4   :  { %1766 = vsyncadd [#allocation15], 4294963200  ;;  %vm191_vm0 = vcmask 130048   ;;  %v182_v0 = vld [vmem:[#allocation7] sm:$0xff]  ;;  %v183_v1 = vld [vmem:[#allocation7 + $0x8] sm:$0xff]  ;;  %vm613_vm1 = vcmask 1041409  }
  0xb5   :  { %v2011_v2 = vld [vmem:[#allocation2] sm:$0xff]  ;;  %v1347_v3 = vpack.c.bf16 %v183_v1, %v182_v0  ;;  %v275_v4 = vld [vmem:[#allocation8] sm:$0xff]  ;;  %v276_v5 = vld [vmem:[#allocation8 + $0x8] sm:$0xff]  ;;  %vm1781_vm2 = vmmov 0  }
  0xb6   :  { %1127 = vmatprep.mubr.msk.f32.mxu1 %vm191_vm0, %v2011_v2  ;;  %v1351_v6 = vpack.c.bf16 %v276_v5, %v275_v4  ;;  %v277_v7 = vld [vmem:[#allocation8 + $0x10] sm:$0xff]  ;;  %v278_v8 = vld [vmem:[#allocation8 + $0x18] sm:$0xff]  ;;  %v2015_v9 = vld [vmem:[#allocation2 + $0x8] sm:$0xff]  ;;  %v588_v57 = vsel %vm191_vm0, %v2011_v2, 0.0 }
  0xb7   :  { %1348 = vmatprep.subr.bf16.mxu1 %v1347_v3  ;;  %v1355_v10 = vpack.c.bf16 %v278_v8, %v277_v7  ;;  %v279_v11 = vld [vmem:[#allocation8 + $0x20] sm:$0xff]  ;;  %v280_v12 = vld [vmem:[#allocation8 + $0x28] sm:$0xff]  ;;  %v281_v14 = vld [vmem:[#allocation8 + $0x30] sm:$0xff]  ;;  %v595_v58 = vsel %vm191_vm0, %v2015_v9, 0.0  ;;  %v589_v59 = vrot.slane %v588_v57, 4 }
  0xb8   :  { %1350 = vmatpush3.bf16.msra.mxu1 %v1347_v3  ;;  %v1359_v13 = vpack.c.bf16 %v280_v12, %v279_v11  ;;  %v282_v15 = vld [vmem:[#allocation8 + $0x38] sm:$0xff]  ;;  %v283_v17 = vld [vmem:[#allocation8 + $0x40] sm:$0xff]  ;;  %v284_v18 = vld [vmem:[#allocation8 + $0x48] sm:$0xff]  ;;  %v596_v60 = vrot.slane %v595_v58, 4  ;;  %v1780_v11 = vmov 0.0|0.0  }
  0xb9   :  { %1352 = vmatprep.subr.bf16.mxu1 %v1351_v6  ;;  %v1363_v16 = vpack.c.bf16 %v282_v15, %v281_v14  ;;  %v1367_v19 = vpack.c.bf16 %v284_v18, %v283_v17  ;;  %v285_v20 = vld [vmem:[#allocation8 + $0x50] sm:$0xff]  ;;  %v286_v21 = vld [vmem:[#allocation8 + $0x58] sm:$0xff]  ;;  %v287_v23 = vld [vmem:[#allocation8 + $0x60] sm:$0xff]  ;;  %v590_v61 = vadd.f32 %v589_v59, %v588_v57 }
  0xba   :  { %v1371_v22 = vpack.c.bf16 %v286_v21, %v285_v20  ;;  %v288_v24 = vld [vmem:[#allocation8 + $0x68] sm:$0xff]  ;;  %v289_v26 = vld [vmem:[#allocation8 + $0x70] sm:$0xff]  ;;  %v290_v27 = vld [vmem:[#allocation8 + $0x78] sm:$0xff]  ;;  %v597_v62 = vadd.f32 %v596_v60, %v595_v58 }
  0xbb   :  { %1128 = vmatmul.mubr.msk.f32.vlgmr.msra.gmra.mrb[0].mxu1 %vm191_vm0, %v2015_v9  ;;  %v1375_v25 = vpack.c.bf16 %v288_v24, %v287_v23  ;;  %v1379_v28 = vpack.c.bf16 %v290_v27, %v289_v26  ;;  %v375_v29 = vld [vmem:[#allocation10] sm:$0xff]  ;;  %v376_v30 = vld [vmem:[#allocation10 + $0x8] sm:$0xff]  ;;  %v377_v31 = vld [vmem:[#allocation10 + $0x10] sm:$0xff]  ;;  %v591_v63 = vrot.slane %v590_v61, 2 }
  0xbc   :  { %1354 = vmatpush3.bf16.msra.mxu1 %v1351_v6  ;;  %v1383_v32 = vpack.c.bf16 %v376_v30, %v375_v29  ;;  %v378_v33 = vld [vmem:[#allocation10 + $0x18] sm:$0xff]  ;;  %v379_v35 = vld [vmem:[#allocation10 + $0x20] sm:$0xff]  ;;  %v380_v36 = vld [vmem:[#allocation10 + $0x28] sm:$0xff]  ;;  %v598_v0 = vrot.slane %v597_v62, 2 }
  0xbd   :  { %1356 = vmatprep.subr.bf16.mxu1 %v1355_v10  ;;  %v1387_v34 = vpack.c.bf16 %v378_v33, %v377_v31  ;;  %v1391_v37 = vpack.c.bf16 %v380_v36, %v379_v35  ;;  %v381_v38 = vld [vmem:[#allocation10 + $0x30] sm:$0xff]  ;;  %v382_v39 = vld [vmem:[#allocation10 + $0x38] sm:$0xff]  ;;  %v383_v41 = vld [vmem:[#allocation10 + $0x40] sm:$0xff]  ;;  %v592_v1 = vadd.f32 %v591_v63, %v590_v61 }
  0xbe   :  { %1384 = vmatprep.subr.bf16.mxu0 %v1383_v32  ;;  %v1395_v40 = vpack.c.bf16 %v382_v39, %v381_v38  ;;  %v384_v42 = vld [vmem:[#allocation10 + $0x48] sm:$0xff]  ;;  %v385_v44 = vld [vmem:[#allocation10 + $0x50] sm:$0xff]  ;;  %v386_v45 = vld [vmem:[#allocation10 + $0x58] sm:$0xff]  ;;  %v599_v3 = vadd.f32 %v598_v0, %v597_v62 }
  0xbf   :  { %1386 = vmatpush3.bf16.msra.mxu0 %v1383_v32  ;;  %v1399_v43 = vpack.c.bf16 %v384_v42, %v383_v41  ;;  %v1403_v46 = vpack.c.bf16 %v386_v45, %v385_v44  ;;  %v387_v47 = vld [vmem:[#allocation10 + $0x60] sm:$0xff]  ;;  %v388_v48 = vld [vmem:[#allocation10 + $0x68] sm:$0xff]  ;;  %v1000_v50 = vld [vmem:[%s2104_s3] ss:$0 sm:$0xff]  ;;  %v593_v6 = vrot.slane %v592_v1, 1  ;;  %v1782_v45 = vmov 0.0  }
  0xc0   :  { %1358 = vmatpush3.bf16.msra.mxu1 %v1355_v10  ;;  %1388 = vmatprep.subr.bf16.mxu0 %v1387_v34  ;;  %v1407_v49 = vpack.c.bf16 %v388_v48, %v387_v47  ;;  %v389_v4 = vld [vmem:[#allocation10 + $0x70] sm:$0xff]  ;;  %v390_v5 = vld [vmem:[#allocation10 + $0x78] sm:$0xff]  ;;  %v600_v7 = vrot.slane %v599_v3, 1  ;;  %v475_v12 = vld [vmem:[#allocation11] sm:$0xff] }
  0xc1   :  { %1360 = vmatprep.subr.bf16.mxu1 %v1359_v13  ;;  %v1411_v8 = vpack.c.bf16 %v390_v5, %v389_v4  ;;  %v594_v10 = vadd.f32 %v593_v6, %v592_v1  ;;  %v477_v15 = vld [vmem:[#allocation11 + $0x10] sm:$0xff]  ;;  %v479_v18 = vld [vmem:[#allocation11 + $0x20] sm:$0xff]  ;;  %v488_v31 = vld [vmem:[#allocation11 + $0x68] sm:$0xff] }
  0xc2   :  { %v601_v2 = vadd.f32 %v600_v7, %v599_v3  ;;  %v481_v21 = vld [vmem:[#allocation11 + $0x30] sm:$0xff]  ;;  %v483_v24 = vld [vmem:[#allocation11 + $0x40] sm:$0xff]  ;;  %v1003_v33 = vld [vmem:[%s2106_s5] ss:$0 sm:$0xff] }
  0xc3   :  { %1390 = vmatpush3.bf16.msra.mxu0 %v1387_v34  ;;  %v485_v27 = vld [vmem:[#allocation11 + $0x50] sm:$0xff]  ;;  %v487_v30 = vld [vmem:[#allocation11 + $0x60] sm:$0xff]  ;;  %v689_v44 = vld [vmem:[#allocation13 + $0x8] sm:$0xff] }
  0xc4   :  { %1362 = vmatpush3.bf16.msra.mxu1 %v1359_v13  ;;  %1392 = vmatprep.subr.bf16.mxu0 %v1391_v37  ;;  %v614_v9 = vsel %vm613_vm1, %v601_v2, %v594_v10  ;;  %v476_v13 = vld [vmem:[#allocation11 + $0x8] sm:$0xff]  ;;  %v1439_v32 = vpack.c.bf16 %v488_v31, %v487_v30  ;;  %v603_v38 = vld [vmem:[%s2111_s10 + $0x8] sm:$0xff]  ;;  %v690_v47 = vld [vmem:[#allocation13 + $0x10] sm:$0xff] }
  0xc5   :  { %1364 = vmatprep.subr.bf16.mxu1 %v1363_v16  ;;  %v1415_v14 = vpack.c.bf16 %v476_v13, %v475_v12  ;;  %v691_v48 = vld [vmem:[#allocation13 + $0x18] sm:$0xff]  ;;  %v697_v57 = vld [vmem:[#allocation13 + $0x48] sm:$0xff]  ;;  %v698_v59 = vld [vmem:[#allocation13 + $0x50] sm:$0xff] }
  0xc6   :  { %v699_v60 = vld [vmem:[#allocation13 + $0x58] sm:$0xff]  ;;  %v700_v62 = vld [vmem:[#allocation13 + $0x60] sm:$0xff]  ;;  %v701_v63 = vld [vmem:[#allocation13 + $0x68] sm:$0xff] }
  0xc7   :  { %1394 = vmatpush3.bf16.msra.mxu0 %v1391_v37  ;;  %v602_v37 = vld [vmem:[%s2111_s10] sm:$0xff]  ;;  %v1466_v61 = vpack.c.bf16 %v699_v60, %v698_v59  ;;  %v1469_v0 = vpack.c.bf16 %v701_v63, %v700_v62  ;;  %v489_v1 = vld [vmem:[#allocation11 + $0x70] sm:$0xff]  ;;  %v782_v12 = vld [vmem:[#allocation14] sm:$0xff] }
  0xc8   :  { %1366 = vmatpush3.bf16.msra.mxu1 %v1363_v16  ;;  %1396 = vmatprep.subr.bf16.mxu0 %v1395_v40  ;;  %v478_v16 = vld [vmem:[#allocation11 + $0x18] sm:$0xff]  ;;  %v1448_v41 = vpack.c.bf16 %v603_v38, %v602_v37  ;;  %v702_v5 = vld [vmem:[#allocation13 + $0x70] sm:$0xff]  ;;  %v783_v13 = vld [vmem:[#allocation14 + $0x8] sm:$0xff] }
  0xc9   :  { %1368 = vmatprep.subr.bf16.mxu1 %v1367_v19  ;;  %v1419_v17 = vpack.c.bf16 %v478_v16, %v477_v15  ;;  %v490_v3 = vld [vmem:[#allocation11 + $0x78] sm:$0xff]  ;;  %v794_v38 = vld [vmem:[#allocation14 + $0x60] sm:$0xff]  ;;  %v886_v59 = vld [vmem:[#allocation16 + $0x50] sm:$0xff] }
  0xca   :  { %v1443_v4 = vpack.c.bf16 %v490_v3, %v489_v1  ;;  %v703_v6 = vld [vmem:[#allocation13 + $0x78] sm:$0xff]  ;;  %v888_v62 = vld [vmem:[#allocation16 + $0x60] sm:$0xff]  ;;  %v889_v63 = vld [vmem:[#allocation16 + $0x68] sm:$0xff] }
  0xcb   :  { %1398 = vmatpush3.bf16.msra.mxu0 %v1395_v40  ;;  %v1472_v7 = vpack.c.bf16 %v703_v6, %v702_v5  ;;  %v1006_v15 = vld [vmem:[%s2112_s11] ss:$0 sm:$0xff] }
  0xcc   :  { %1370 = vmatpush3.bf16.msra.mxu1 %v1367_v19  ;;  %1400 = vmatprep.subr.bf16.mxu0 %v1399_v43  ;;  %v480_v19 = vld [vmem:[#allocation11 + $0x28] sm:$0xff]  ;;  %v789_v30 = vld [vmem:[#allocation14 + $0x38] sm:$0xff] }
  0xcd   :  { %1372 = vmatprep.subr.bf16.mxu1 %v1371_v22  ;;  %v1423_v20 = vpack.c.bf16 %v480_v19, %v479_v18  ;;  %v1475_v18 = vpack.c.bf16 %v783_v13, %v782_v12  ;;  %v887_v60 = vld [vmem:[#allocation16 + $0x58] sm:$0xff] }
  0xce   :  { %v1008_v3 = vld [vmem:[%s2114_s13] ss:$0 sm:$0xff] }
  0xcf   :  { %1402 = vmatpush3.bf16.msra.mxu0 %v1399_v43  ;;  %v688_v43 = vld [vmem:[#allocation13] sm:$0xff]  ;;  %v1009_v12 = vld [vmem:[%s2116_s15] ss:$0 sm:$0xff] }
  0xd0   :  { %1374 = vmatpush3.bf16.msra.mxu1 %v1371_v22  ;;  %1404 = vmatprep.subr.bf16.mxu0 %v1403_v46  ;;  %v482_v22 = vld [vmem:[#allocation11 + $0x38] sm:$0xff] }
  0xd1   :  { %1376 = vmatprep.subr.bf16.mxu1 %v1375_v25  ;;  %v1427_v23 = vpack.c.bf16 %v482_v22, %v481_v21  ;;  %v784_v22 = vld [vmem:[#allocation14 + $0x10] sm:$0xff] }
  0xd3   :  { %1406 = vmatpush3.bf16.msra.mxu0 %v1403_v46  ;;  %v1451_v46 = vpack.c.bf16 %v689_v44, %v688_v43  ;;  %v876_v44 = vld [vmem:[#allocation16] sm:$0xff] }
  0xd4   :  { %1378 = vmatpush3.bf16.msra.mxu1 %v1375_v25  ;;  %1408 = vmatprep.subr.bf16.mxu0 %v1407_v49  ;;  %v484_v25 = vld [vmem:[#allocation11 + $0x48] sm:$0xff] }
  0xd5   :  { %1380 = vmatprep.subr.bf16.mxu1 %v1379_v28  ;;  %v1431_v26 = vpack.c.bf16 %v484_v25, %v483_v24 }
  0xd7   :  { %1410 = vmatpush3.bf16.msra.mxu0 %v1407_v49  ;;  %v1454_v49 = vpack.c.bf16 %v691_v48, %v690_v47  ;;  %v879_v48 = vld [vmem:[#allocation16 + $0x18] sm:$0xff] }
  0xd8   :  { %1382 = vmatpush3.bf16.msra.mxu1 %v1379_v28  ;;  %1412 = vmatprep.subr.bf16.mxu0 %v1411_v8  ;;  %v486_v28 = vld [vmem:[#allocation11 + $0x58] sm:$0xff] }
  0xd9   :  { %1416 = vmatprep.subr.bf16.mxu1 %v1415_v14  ;;  %v1435_v29 = vpack.c.bf16 %v486_v28, %v485_v27  ;;  %v787_v27 = vld [vmem:[#allocation14 + $0x28] sm:$0xff] }
  0xdb   :  { %1414 = vmatpush3.bf16.msra.mxu0 %v1411_v8  ;;  %v1004_v8 = vld [vmem:[%s2108_s7] ss:$0 sm:$0xff] }
  0xdc   :  { %1447 = vmatprep.subr.bf16.mxu0 %v1780_v11 }
 0x18e   :  { %v1129_v51 = vpop.f32.mrb[0].mxu1 }
 0x18f   :  { %v270_v52 = vadd.f32 %v1129_v51, %v1000_v50  ;;  %v264_v53 = vpop.f32.mrb[1].mxu1  ;;  %v693_v51 = vld [vmem:[#allocation13 + $0x28] sm:$0xff] }
 0x190   :  { %v265_v54 = vadd.f32 %v1000_v50, %v264_v53  ;;  %v692_v50 = vld [vmem:[#allocation13 + $0x20] sm:$0xff]  ;;  %v694_v53 = vld [vmem:[#allocation13 + $0x30] sm:$0xff] }
 0x191   :  { %v274_v56 = vmax.f32 %v270_v52, 0.0  ;;  %v1457_v52 = vpack.c.bf16 %v693_v51, %v692_v50  ;;  %v880_v50 = vld [vmem:[#allocation16 + $0x20] sm:$0xff]  ;;  %v881_v51 = vld [vmem:[#allocation16 + $0x28] sm:$0xff] }
 0x192   :  { %v273_v55 = vmax.f32 %v265_v54, 0.0  ;;  %v695_v54 = vld [vmem:[#allocation13 + $0x38] sm:$0xff] }
 0x194   :  { %1162 = vmatprep.mubr.f32.mxu1 %v273_v55  ;;  %v1460_v55 = vpack.c.bf16 %v695_v54, %v694_v53  ;;  %v882_v53 = vld [vmem:[#allocation16 + $0x30] sm:$0xff]  ;;  %v883_v54 = vld [vmem:[#allocation16 + $0x38] sm:$0xff] }
 0x195   :  { %1163 = vmatmul.mubr.f32.vlgmr.msra.gmra.mrb[2].mxu1 %v274_v56  ;;  %v696_v56 = vld [vmem:[#allocation13 + $0x40] sm:$0xff] }
 0x196   :  { %1418 = vmatpush3.bf16.msra.mxu1 %v1415_v14  ;;  %v1463_v58 = vpack.c.bf16 %v697_v57, %v696_v56  ;;  %v884_v56 = vld [vmem:[#allocation16 + $0x40] sm:$0xff]  ;;  %v885_v57 = vld [vmem:[#allocation16 + $0x48] sm:$0xff] }
 0x197   :  { %1420 = vmatprep.subr.bf16.mxu1 %v1419_v17 }
 0x19a   :  { %1422 = vmatpush3.bf16.msra.mxu1 %v1419_v17 }
 0x19b   :  { %1424 = vmatprep.subr.bf16.mxu1 %v1423_v20 }
 0x19e   :  { %1426 = vmatpush3.bf16.msra.mxu1 %v1423_v20 }
 0x19f   :  { %1428 = vmatprep.subr.bf16.mxu1 %v1427_v23 }
 0x1a2   :  { %1430 = vmatpush3.bf16.msra.mxu1 %v1427_v23  ;;  %v785_v23 = vld [vmem:[#allocation14 + $0x18] sm:$0xff] }
 0x1a3   :  { %1432 = vmatprep.subr.bf16.mxu1 %v1431_v26  ;;  %v1478_v25 = vpack.c.bf16 %v785_v23, %v784_v22 }
 0x1a6   :  { %1434 = vmatpush3.bf16.msra.mxu1 %v1431_v26  ;;  %v786_v26 = vld [vmem:[#allocation14 + $0x20] sm:$0xff] }
 0x1a7   :  { %1436 = vmatprep.subr.bf16.mxu1 %v1435_v29  ;;  %v1481_v28 = vpack.c.bf16 %v787_v27, %v786_v26 }
 0x1aa   :  { %1438 = vmatpush3.bf16.msra.mxu1 %v1435_v29  ;;  %v788_v29 = vld [vmem:[#allocation14 + $0x30] sm:$0xff] }
 0x1ab   :  { %1440 = vmatprep.subr.bf16.mxu1 %v1439_v32  ;;  %v1484_v31 = vpack.c.bf16 %v789_v30, %v788_v29 }
 0x1ae   :  { %1442 = vmatpush3.bf16.msra.mxu1 %v1439_v32  ;;  %v790_v32 = vld [vmem:[#allocation14 + $0x40] sm:$0xff] }
 0x1af   :  { %1444 = vmatprep.subr.bf16.mxu1 %v1443_v4 }
 0x1b2   :  { %1446 = vmatpush3.bf16.msra.mxu1 %v1443_v4 }
 0x1b3   :  { %1474 = vmatprep.subr.bf16.mxu1 %v1780_v11 }
 0x268   :  { %v1164_v34 = vpop.f32.mrb[2].mxu1 }
 0x269   :  { %v370_v35 = vadd.f32 %v1164_v34, %v1003_v33  ;;  %v364_v36 = vpop.f32.mrb[3].mxu1 }
 0x26a   :  { %v365_v39 = vadd.f32 %v1003_v33, %v364_v36  ;;  %v791_v33 = vld [vmem:[#allocation14 + $0x48] sm:$0xff]  ;;  %v793_v36 = vld [vmem:[#allocation14 + $0x58] sm:$0xff] }
 0x26b   :  { %v374_v42 = vmax.f32 %v370_v35, 0.0  ;;  %v1487_v34 = vpack.c.bf16 %v791_v33, %v790_v32  ;;  %v792_v35 = vld [vmem:[#allocation14 + $0x50] sm:$0xff] }
 0x26c   :  { %v373_v40 = vmax.f32 %v365_v39, 0.0  ;;  %v1490_v37 = vpack.c.bf16 %v793_v36, %v792_v35  ;;  %v795_v39 = vld [vmem:[#allocation14 + $0x68] sm:$0xff] }
 0x26e   :  { %1197 = vmatprep.mubr.f32.mxu0 %v373_v40  ;;  %v1493_v40 = vpack.c.bf16 %v795_v39, %v794_v38 }
 0x26f   :  { %1198 = vmatmul.mubr.f32.vlgmr.msra.gmra.mrb[0].mxu0 %v374_v42  ;;  %v797_v42 = vld [vmem:[#allocation14 + $0x78] sm:$0xff] }
 0x270   :  { %1449 = vmatpush3.bf16.msra.mxu0 %v1448_v41  ;;  %1239 = vmatprep.mubr.msk.f32.mxu0 %vm1781_vm2, %v1782_v45  ;;  %v796_v41 = vld [vmem:[#allocation14 + $0x70] sm:$0xff] }
 0x271   :  { %1450 = vmatprep.subr.bf16.mxu0 %v1780_v11  ;;  %v1496_v43 = vpack.c.bf16 %v797_v42, %v796_v41 }
 0x273   :  { %1240 = vmatmul.mubr.msk.f32.vlgmr.msra.gmra.mrb[2].mxu0 %vm191_vm0, %v614_v9 }
 0x274   :  { %1452 = vmatpush3.bf16.msra.mxu0 %v1451_v46  ;;  %1274 = vmatprep.mubr.msk.f32.mxu0 %vm1781_vm2, %v1782_v45  ;;  %v878_v46 = vld [vmem:[#allocation16 + $0x10] sm:$0xff] }
 0x275   :  { %1453 = vmatprep.subr.bf16.mxu0 %v1780_v11 }
 0x278   :  { %1455 = vmatpush3.bf16.msra.mxu0 %v1454_v49  ;;  %v1502_v49 = vpack.c.bf16 %v879_v48, %v878_v46 }
 0x279   :  { %1456 = vmatprep.subr.bf16.mxu0 %v1780_v11 }
 0x27c   :  { %1458 = vmatpush3.bf16.msra.mxu0 %v1457_v52  ;;  %v1505_v52 = vpack.c.bf16 %v881_v51, %v880_v50 }
 0x27d   :  { %1459 = vmatprep.subr.bf16.mxu0 %v1780_v11 }
 0x280   :  { %1461 = vmatpush3.bf16.msra.mxu0 %v1460_v55  ;;  %v1508_v55 = vpack.c.bf16 %v883_v54, %v882_v53 }
 0x281   :  { %1462 = vmatprep.subr.bf16.mxu0 %v1780_v11 }
 0x284   :  { %1464 = vmatpush3.bf16.msra.mxu0 %v1463_v58  ;;  %v1511_v58 = vpack.c.bf16 %v885_v57, %v884_v56 }
 0x285   :  { %1465 = vmatprep.subr.bf16.mxu0 %v1780_v11 }
 0x288   :  { %1467 = vmatpush3.bf16.msra.mxu0 %v1466_v61  ;;  %v1514_v61 = vpack.c.bf16 %v887_v60, %v886_v59 }
 0x289   :  { %1468 = vmatprep.subr.bf16.mxu0 %v1780_v11 }
 0x28c   :  { %1470 = vmatpush3.bf16.msra.mxu0 %v1469_v0  ;;  %v1517_v0 = vpack.c.bf16 %v889_v63, %v888_v62 }
 0x28d   :  { %1471 = vmatprep.subr.bf16.mxu0 %v1780_v11 }
 0x290   :  { %1473 = vmatpush3.bf16.msra.mxu0 %v1472_v7 }
 0x291   :  { %1498 = vmatprep.subr.bf16.mxu0 %v1780_v11 }
 0x342   :  { %v1199_v10 = vpop.f32.mrb[0].mxu0 }
 0x343   :  { %v470_v2 = vadd.f32 %v1199_v10, %v1004_v8  ;;  %v464_v9 = vpop.f32.mrb[1].mxu0  ;;  %v890_v10 = vld [vmem:[#allocation16 + $0x70] sm:$0xff] }
 0x344   :  { %v465_v14 = vadd.f32 %v1004_v8, %v464_v9 }
 0x345   :  { %v474_v19 = vmax.f32 %v470_v2, 0.0  ;;  %v891_v2 = vld [vmem:[#allocation16 + $0x78] sm:$0xff] }
 0x346   :  { %v473_v16 = vmax.f32 %v465_v14, 0.0  ;;  %v683_v17 = vpop.f32.mrb[2].mxu0  ;;  %v1520_v9 = vpack.c.bf16 %v891_v2, %v890_v10 }
 0x347   :  { %v684_v20 = vadd.f32 %v1006_v15, %v683_v17  ;;  %v1241_v21 = vpop.f32.mrb[3].mxu0 }
 0x348   :  { %1232 = vmatprep.mubr.f32.mxu1 %v473_v16  ;;  %v1005_v16 = vld [vmem:[%s2110_s9] ss:$0 sm:$0xff]  ;;  %s1783_s9 = smov [#allocation17]  }
 0x349   :  { %v687_v24 = vmax.f32 %v684_v20, 0.0  ;;  %1233 = vmatmul.mubr.f32.vlgmr.msra.gmra.mrb[4].mxu1 %v474_v19  ;;  %s987_s30 = sshll.u32 %s1783_s9, 4  ;;  %s988_s30 = int_to_ptr.vmem [resolvable:$true] %s987_s30 }
 0x34a   :  { %1476 = vmatpush3.bf16.msra.mxu1 %v1475_v18  ;;  %1309 = vmatprep.mubr.msk.f32.mxu1 %vm1781_vm2, %v1782_v45  ;;  %v573_v18 = vld [vmem:[#allocation5] sm:$0xff]  ;;  %s1735_s21 = scalar_lea.vmem %s988_s30, 32  ;;  %p1740_p3 = scmp.lt.s32.totalorder %s988_s30, %s988_s30 }
 0x34b   :  { %1275 = vmatmul.mubr.f32.vlgmr.msra.gmra.mrb[4].mxu0 %v687_v24  ;;  %1477 = vmatprep.subr.bf16.mxu1 %v1780_v11  ;;  %p1736_p2 = scmp.ne.s32.totalorder %s988_s30, %s1735_s21  ;;  %p1741_p4 = scmp.lt.s32.totalorder %s1735_s21, %s1735_s21 }
 0x34c   :  { %1344 = vmatprep.mubr.msk.f32.mxu0 %vm1781_vm2, %v1782_v45  ;;  %v877_v45 = vld [vmem:[#allocation16 + $0x8] sm:$0xff] }
 0x34d   :  { %v1499_v47 = vpack.c.bf16 %v877_v45, %v876_v44  ;;  %p1742_p5 = por %p1741_p4, %p1740_p3 }
 0x34e   :  { %1479 = vmatpush3.bf16.msra.mxu1 %v1478_v25 }
 0x34f   :  { %1480 = vmatprep.subr.bf16.mxu1 %v1780_v11  ;;  %1500 = vmatpush3.bf16.msra.mxu0 %v1499_v47  ;;  %p1743_p6 = pnand %p1742_p5, %p1736_p2 }
 0x350   :  { %1501 = vmatprep.subr.bf16.mxu0 %v1780_v11 }
 0x352   :  { %1482 = vmatpush3.bf16.msra.mxu1 %v1481_v28 }
 0x353   :  { %1483 = vmatprep.subr.bf16.mxu1 %v1780_v11  ;;  %1503 = vmatpush3.bf16.msra.mxu0 %v1502_v49 }
 0x354   :  { %1504 = vmatprep.subr.bf16.mxu0 %v1780_v11 }
 0x356   :  { %1485 = vmatpush3.bf16.msra.mxu1 %v1484_v31  ;;  %v1010_v31 = vld [vmem:[%s2118_s17] ss:$0 sm:$0xff] }
 0x357   :  { %1486 = vmatprep.subr.bf16.mxu1 %v1780_v11  ;;  %1506 = vmatpush3.bf16.msra.mxu0 %v1505_v52 }
 0x358   :  { %1507 = vmatprep.subr.bf16.mxu0 %v1780_v11 }
 0x35a   :  { %1488 = vmatpush3.bf16.msra.mxu1 %v1487_v34 }
 0x35b   :  { %1489 = vmatprep.subr.bf16.mxu1 %v1780_v11  ;;  %1509 = vmatpush3.bf16.msra.mxu0 %v1508_v55 }
 0x35c   :  { %1510 = vmatprep.subr.bf16.mxu0 %v1780_v11 }
 0x35e   :  { %1491 = vmatpush3.bf16.msra.mxu1 %v1490_v37 }
 0x35f   :  { %1492 = vmatprep.subr.bf16.mxu1 %v1780_v11  ;;  %1512 = vmatpush3.bf16.msra.mxu0 %v1511_v58 }
 0x360   :  { %1513 = vmatprep.subr.bf16.mxu0 %v1780_v11 }
 0x362   :  { %1494 = vmatpush3.bf16.msra.mxu1 %v1493_v40 }
 0x363   :  { %1495 = vmatprep.subr.bf16.mxu1 %v1780_v11  ;;  %1515 = vmatpush3.bf16.msra.mxu0 %v1514_v61 }
 0x364   :  { %1516 = vmatprep.subr.bf16.mxu0 %v1780_v11 }
 0x366   :  { %1497 = vmatpush3.bf16.msra.mxu1 %v1496_v43 }
 0x367   :  { %1518 = vmatpush3.bf16.msra.mxu0 %v1517_v0 }
 0x368   :  { %1519 = vmatprep.subr.bf16.mxu0 %v1780_v11 }
 0x36b   :  { %1521 = vmatpush3.bf16.msra.mxu0 %v1520_v9 }
 0x41c   :  { %v1234_v1 = vpop.f32.mrb[4].mxu1 }
 0x41d   :  { %v564_v4 = vpop.f32.mrb[5].mxu1  ;;  %v570_v19 = vadd.f32 %v1234_v1, %v1005_v16 }
 0x41e   :  { %v777_v5 = vpop.f32.mrb[4].mxu0  ;;  %v565_v17 = vadd.f32 %v1005_v16, %v564_v4 }
 0x41f   :  { %v778_v6 = vadd.f32 %v1008_v3, %v777_v5  ;;  %v1276_v7 = vpop.f32.mrb[5].mxu0  ;;  %v575_v21 = vmul.f32 %v573_v18, %v570_v19 }
 0x420   :  { %v574_v20 = vmul.f32 %v573_v18, %v565_v17 }
 0x421   :  { %v781_v8 = vmax.f32 %v778_v6, 0.0  ;;  %v582_v23 = vrot.slane %v575_v21, 4 }
 0x422   :  { %v576_v22 = vrot.slane %v574_v20, 4 }
 0x423   :  { %1310 = vmatmul.mubr.f32.vlgmr.msra.gmra.mrb[6].mxu1 %v781_v8  ;;  %v583_v25 = vadd.f32 %v582_v23, %v575_v21 }
 0x424   :  { %v577_v24 = vadd.f32 %v576_v22, %v574_v20 }
 0x425   :  { %v584_v27 = vrot.slane %v583_v25, 2 }
 0x426   :  { %v578_v26 = vrot.slane %v577_v24, 2 }
 0x427   :  { %v585_v29 = vadd.f32 %v584_v27, %v583_v25 }
 0x428   :  { %v579_v28 = vadd.f32 %v578_v26, %v577_v24 }
 0x429   :  { %v586_v32 = vrot.slane %v585_v29, 1 }
 0x42a   :  { %v580_v30 = vrot.slane %v579_v28, 1 }
 0x42b   :  { %v587_v37 = vadd.f32 %v586_v32, %v585_v29 }
 0x42c   :  { %v581_v34 = vadd.f32 %v580_v30, %v579_v28 }
 0x4f6   :  { %v871_v11 = vpop.f32.mrb[6].mxu1 }
 0x4f7   :  { %v872_v13 = vadd.f32 %v1009_v12, %v871_v11  ;;  %v1311_v14 = vpop.f32.mrb[7].mxu1 }
 0x4f9   :  { %v875_v15 = vmax.f32 %v872_v13, 0.0 }
 0x4fb   :  { %1345 = vmatmul.mubr.f32.vlgmr.msra.gmra.mrb[6].mxu0 %v875_v15 }
 0x5ce   :  { %v965_v33 = vpop.f32.mrb[6].mxu0 }
 0x5cf   :  { %v966_v35 = vadd.f32 %v1010_v31, %v965_v33  ;;  %v1346_v36 = vpop.f32.mrb[7].mxu0 }
 0x5d1   :  { %v970_v38 = vrot.slane %v966_v35, 1  ;;  %v973_v39 = vadd.f32 %v966_v35, %v581_v34 }
 0x5d3   :  { %v974_v40 = vadd.f32 %v970_v38, %v587_v37 }
 0x5d5   :  { %v977_v41 = vrot.slane %v974_v40, 7 }
 0x5d7   :  { %v978_v42 = vsel %vm613_vm1, %v977_v41, %v973_v39 }
 0x5d8   :  { %980 = vst [vmem:[#allocation17] sm:$0x3] %v978_v42 }
 0x5d9   :  { %1746 = shalt.err (!%p1743_p6)
}
 0x5da   :  { %s1747_s14 = scalar_lea.hbm %s2119_s18, 32 }
 0x5db   :  { %p1748_p7 = scmp.ne.s32.totalorder %s2119_s18, %s1747_s14  ;;  %p1751_p8 = scmp.lt.u32.totalorder %s1747_s14, %s2119_s18 }
 0x5dd   :  { %p1753_p9 = pnand %p1751_p8, %p1748_p7 }
 0x5df   :  { %1756 = shalt.err (!%p1753_p9)
}
 0x5e0   :  { %990 = dma.vmem_to_hbm [thread:$0]  %s988_s30, 32, %s2119_s18, [#allocation4]  }
 0x5e1   :  { %1767 = dma.done.wait [#allocation4], 32  }
 0x5e2   :  { %1768 = vsyncadd [#allocation4], 4294967264 }
 0x5e3   :  { %994 = vsyncpa [#allocation3], 1 }
 0x5e4   :  { %995 = vsyncpa [#allocation6], 1 }
 0x5e5   :  { %996 = vsyncpa [#allocation9], 1 }
 0x5e6   :  { %997 = vsyncpa [#allocation12], 1 }
 0x5e7   :  { %998 = vsyncpa [#allocation15], 1 }
 0x5e8   :  { %999 = vsyncpa [#allocation4], 1 }

</bundles_post_ra>
